<compile_context>
chip_gen: v5e
topology: v5e:2x2
jax: 0.10.0
libtpu: 0.0.40
codegen_flags: <defaults>
</compile_context>

<pallas_src>
import jax
import jax.numpy as jnp
from jax import lax
from jax.experimental import pallas as pl
from jax.experimental.pallas import tpu as pltpu


def _search_kernel(q_ref, w_ref, id_ref, out_ref, max_sc):
    # q_ref:   (TB, D)           queries tile (un-normalized)
    # w_ref:   (D, TN)           pre-normalized, transposed weight tile
    # id_ref:  (1, num_labels)   one-hot(idx) row, resident across the grid
    # out_ref: (TB, num_labels)  output tile (written on the last candidate tile)
    # max_sc:  (TB, 1)           running max over candidate tiles (VMEM scratch)
    j = pl.program_id(1)

    @pl.when(j == 0)
    def _():
        max_sc[...] = jnp.full_like(max_sc, -jnp.inf)

    q = q_ref[...].astype(jnp.float32)                               # (TB, D)
    inv_norm = lax.rsqrt(jnp.sum(q * q, axis=-1, keepdims=True))     # EUP rsqrt
    qn = q * inv_norm

    sims = jnp.dot(qn, w_ref[...].astype(jnp.float32),
                   preferred_element_type=jnp.float32)               # (TB, TN)
    max_sc[...] = jnp.maximum(max_sc[...],
                              jnp.max(sims, axis=-1, keepdims=True))

    @pl.when(j == pl.num_programs(1) - 1)
    def _():
        out_ref[...] = (id_ref[...].astype(jnp.float32)
                        * max_sc[...]).astype(out_ref.dtype)


def search_forward(queries, weight, id_vec, *, tb=8, tn=128):
    """queries: (B, D); weight: (D, N) already normalized+transposed; id_vec: (num_labels,)."""
    B, D = queries.shape
    Dw, N = weight.shape
    assert Dw == D, (Dw, D)
    num_labels = id_vec.shape[0]

    # --- batch tiling: multiple of 8 sublanes (or full B when B < 8) ---
    if B < 8:
        tb = B
    else:
        tb = max(8, (min(tb, B) // 8) * 8)
    Bp = pl.cdiv(B, tb) * tb
    if Bp != B:
        # pad with dummy rows of ones (finite norm); padded rows are sliced off below
        queries = jnp.concatenate(
            [queries, jnp.ones((Bp - B, D), queries.dtype)], axis=0)

    # --- candidate tiling: multiple of 128 lanes (or full N when N < 128) ---
    if N < 128:
        tn = N
    else:
        tn = max(128, (min(tn, N) // 128) * 128)
    Np = pl.cdiv(N, tn) * tn
    if Np != N:
        # pad with duplicates of column 0: duplicates never change the row-wise max
        dup = jnp.broadcast_to(weight[:, :1], (D, Np - N))
        weight = jnp.concatenate([weight, dup], axis=1)

    id2 = id_vec.reshape(1, num_labels).astype(jnp.float32)

    out = pl.pallas_call(
        _search_kernel,
        out_shape=jax.ShapeDtypeStruct((Bp, num_labels), queries.dtype),
        grid_spec=pltpu.PrefetchScalarGridSpec(
            num_scalar_prefetch=0,
            grid=(Bp // tb, Np // tn),
            in_specs=[
                pl.BlockSpec((tb, D), lambda i, j: (i, 0)),
                pl.BlockSpec((D, tn), lambda i, j: (0, j)),
                pl.BlockSpec((1, num_labels), lambda i, j: (0, 0)),
            ],
            out_specs=pl.BlockSpec((tb, num_labels), lambda i, j: (i, 0)),
            scratch_shapes=[pltpu.VMEM((tb, 1), jnp.float32)],
        ),
        compiler_params=pltpu.CompilerParams(
            dimension_semantics=("parallel", "arbitrary")),
    )(queries, weight, id2)

    return out[:B]


class SearchLayerPallas:
    """Mirror of the PyTorch SearchLayer (forward pass only; weights are frozen)."""

    def __init__(self, initial_weight, idx, num_labels):
        self.num_labels = num_labels
        w = initial_weight / jnp.linalg.norm(initial_weight, axis=-1, keepdims=True)
        self.weight = jnp.asarray(w.T)                      # (embed_dim, N)
        self.embed_dim = self.weight.shape[0]
        self.id = jax.nn.one_hot(jnp.asarray(idx, jnp.int32), num_labels,
                                 dtype=jnp.float32)         # (num_labels,)

    def __call__(self, queries):
        return search_forward(queries, self.weight, self.id)


def _ref_search(queries, initial_weight, idx, num_labels):
    """Pure-JAX reference matching the PyTorch forward."""
    w = initial_weight / jnp.linalg.norm(initial_weight, axis=-1, keepdims=True)
    qn = queries / jnp.linalg.norm(queries, axis=-1, keepdims=True)
    sims = qn @ w.T
    sim = jnp.max(sims, axis=-1)
    return jax.nn.one_hot(idx, num_labels, dtype=jnp.float32) * sim[:, None]


if __name__ == "__main__":
    B, D, N = 16, 64, 256          # batch, embed_dim, number of index entries
    num_labels, idx = 16, 3

    key = jax.random.PRNGKey(0)
    kw, kq = jax.random.split(key)
    initial_weight = jax.random.normal(kw, (N, D), dtype=jnp.float32)
    queries = jax.random.normal(kq, (B, D), dtype=jnp.float32)

    layer = SearchLayerPallas(initial_weight, idx, num_labels)
    out = jax.block_until_ready(layer(queries))

    ref = _ref_search(queries, initial_weight, idx, num_labels)
    assert out.shape == ref.shape, (out.shape, ref.shape)
    if bool(jnp.allclose(out, ref, atol=1e-4, rtol=1e-4)):
        print("KERNEL_OK")
    else:
        raise SystemExit("mismatch: max abs err = %g"
                         % float(jnp.max(jnp.abs(out - ref))))
</pallas_src>

<mosaic_0001>
module attributes {stable_mosaic.version = 11 : i64} {
  func.func @_search_kernel(%arg0: i32, %arg1: i32, %arg2: memref<8x64xf32, #tpu.memory_space<vmem>>, %arg3: memref<64x128xf32, #tpu.memory_space<vmem>>, %arg4: memref<1x16xf32, #tpu.memory_space<vmem>>, %arg5: memref<8x16xf32, #tpu.memory_space<vmem>>, %arg6: memref<8x1xf32, #tpu.memory_space<vmem>>) attributes {dimension_semantics = [#tpu.dimension_semantics<parallel>, #tpu.dimension_semantics<arbitrary>], iteration_bounds = array<i64: 2, 2>, scalar_prefetch = 0 : i64, scratch_operands = 1 : i64, tpu.core_type = #tpu.core_type<tc>, window_params = [{transform_indices = @transform_0, window_bounds = array<i64: 8, 64>}, {transform_indices = @transform_1, window_bounds = array<i64: 64, 128>}, {pipeline_mode = #tpu.pipeline_mode<synchronous>, transform_indices = @transform_2, window_bounds = array<i64: 1, 16>}, {transform_indices = @transform_3, window_bounds = array<i64: 8, 16>}]} {
    %c0_i32 = arith.constant 0 : i32
    %0 = arith.cmpi eq, %arg1, %c0_i32 : i32
    %1 = arith.extui %0 : i1 to i32
    %c0_i32_0 = arith.constant 0 : i32
    %2 = arith.cmpi ne, %1, %c0_i32_0 : i32
    scf.if %2 {
      %cst_11 = arith.constant 0xFF800000 : f32
      %20 = vector.broadcast %cst_11 : f32 to vector<8x1xf32>
      %c0_12 = arith.constant 0 : index
      %c0_13 = arith.constant 0 : index
      %21 = vector.load %arg6[%c0_12, %c0_13] : memref<8x1xf32, #tpu.memory_space<vmem>>, vector<8x1xf32>
      tpu.vector_store %arg6[%c0_12, %c0_13], %20 {strides = array<i32>} : memref<8x1xf32, #tpu.memory_space<vmem>>, vector<8x1xf32>,
    } else {
    }
    %c0 = arith.constant 0 : index
    %c0_1 = arith.constant 0 : index
    %3 = vector.load %arg2[%c0, %c0_1] : memref<8x64xf32, #tpu.memory_space<vmem>>, vector<8x64xf32>
    %4 = arith.mulf %3, %3 : vector<8x64xf32>
    %cst = arith.constant dense<0.000000e+00> : vector<8xf32>
    %5 = vector.multi_reduction <add>, %4, %cst [1] : vector<8x64xf32> to vector<8xf32>
    %6 = vector.shape_cast %5 : vector<8xf32> to vector<8x1xf32>
    %7 = math.rsqrt %6 : vector<8x1xf32>
    %8 = vector.broadcast %7 : vector<8x1xf32> to vector<8x64xf32>
    %9 = arith.mulf %3, %8 : vector<8x64xf32>
    %c0_2 = arith.constant 0 : index
    %c0_3 = arith.constant 0 : index
    %10 = vector.load %arg3[%c0_2, %c0_3] : memref<64x128xf32, #tpu.memory_space<vmem>>, vector<64x128xf32>
    %cst_4 = arith.constant dense<0.000000e+00> : vector<8x128xf32>
    %11 = tpu.matmul %9, %10, %cst_4 {dimension_numbers = #tpu.dot_dimension_numbers<[1], [0], [0], [1], [0, 0, 1, 1], [], []>} : vector<8x64xf32>, vector<64x128xf32>, vector<8x128xf32> -> vector<8x128xf32>
    %c0_5 = arith.constant 0 : index
    %c0_6 = arith.constant 0 : index
    %12 = vector.load %arg6[%c0_5, %c0_6] : memref<8x1xf32, #tpu.memory_space<vmem>>, vector<8x1xf32>
    %cst_7 = arith.constant dense<0xFF800000> : vector<8xf32>
    %13 = vector.multi_reduction <maximumf>, %11, %cst_7 [1] : vector<8x128xf32> to vector<8xf32>
    %14 = vector.shape_cast %13 : vector<8xf32> to vector<8x1xf32>
    %15 = arith.maximumf %12, %14 : vector<8x1xf32>
    %c0_8 = arith.constant 0 : index
    %c0_9 = arith.constant 0 : index
    %16 = vector.load %arg6[%c0_8, %c0_9] : memref<8x1xf32, #tpu.memory_space<vmem>>, vector<8x1xf32>
    tpu.vector_store %arg6[%c0_8, %c0_9], %15 {strides = array<i32>} : memref<8x1xf32, #tpu.memory_space<vmem>>, vector<8x1xf32>,
    %c1_i32 = arith.constant 1 : i32
    %17 = arith.cmpi eq, %arg1, %c1_i32 : i32
    %18 = arith.extui %17 : i1 to i32
    %c0_i32_10 = arith.constant 0 : i32
    %19 = arith.cmpi ne, %18, %c0_i32_10 : i32
    scf.if %19 {
      %c0_11 = arith.constant 0 : index
      %c0_12 = arith.constant 0 : index
      %20 = vector.load %arg4[%c0_11, %c0_12] : memref<1x16xf32, #tpu.memory_space<vmem>>, vector<1x16xf32>
      %c0_13 = arith.constant 0 : index
      %c0_14 = arith.constant 0 : index
      %21 = vector.load %arg6[%c0_13, %c0_14] : memref<8x1xf32, #tpu.memory_space<vmem>>, vector<8x1xf32>
      %22 = vector.broadcast %20 : vector<1x16xf32> to vector<8x16xf32>
      %23 = vector.broadcast %21 : vector<8x1xf32> to vector<8x16xf32>
      %24 = arith.mulf %22, %23 : vector<8x16xf32>
      %c0_15 = arith.constant 0 : index
      %c0_16 = arith.constant 0 : index
      %25 = vector.load %arg5[%c0_15, %c0_16] : memref<8x16xf32, #tpu.memory_space<vmem>>, vector<8x16xf32>
      tpu.vector_store %arg5[%c0_15, %c0_16], %24 {strides = array<i32>} : memref<8x16xf32, #tpu.memory_space<vmem>>, vector<8x16xf32>,
    } else {
    }
    return
  }
  func.func @transform_0(%arg0: i32, %arg1: i32) -> (i32, i32) {
    %c0_i32 = arith.constant 0 : i32
    %c0_i32_0 = arith.constant 0 : i32
    return %arg0, %c0_i32 : i32, i32
  }
  func.func @transform_1(%arg0: i32, %arg1: i32) -> (i32, i32) {
    %c0_i32 = arith.constant 0 : i32
    %c0_i32_0 = arith.constant 0 : i32
    return %c0_i32, %arg1 : i32, i32
  }
  func.func @transform_2(%arg0: i32, %arg1: i32) -> (i32, i32) {
    %c0_i32 = arith.constant 0 : i32
    %c0_i32_0 = arith.constant 0 : i32
    %c0_i32_1 = arith.constant 0 : i32
    return %c0_i32, %c0_i32_0 : i32, i32
  }
  func.func @transform_3(%arg0: i32, %arg1: i32) -> (i32, i32) {
    %c0_i32 = arith.constant 0 : i32
    %c0_i32_0 = arith.constant 0 : i32
    return %arg0, %c0_i32 : i32, i32
  }
}

</mosaic_0001>

<bundles_post_ra>
// kernel: tpu_custom_call.1
= control target key start
LH: loop header
LB: loop body
LE: loop exit
PB: predicated region body
PF: predicated region fallthrough
CT: control target
= control target key end

     0   :  { %s1029_s0 = inlined_call_operand.hbm [shape: f32[16,64], index: 0, kind: input, shape index: {}]   ;;  %s1030_s1 = inlined_call_operand.hbm [shape: f32[64,256], index: 1, kind: input, shape index: {}]   ;;  %s1031_s2 = inlined_call_operand.vmem [shape: f32[1,16], index: 2, kind: input, shape index: {}]   ;;  %s1032_s3 = inlined_call_operand.hbm [shape: f32[16,16], index: 3, kind: output, shape index: {}]  }
   0x1   :  { %1038 = sst [smem:[#allocation19_spill]] %s1029_s0 }
   0x2   :  { %8 = vsyncpa [#allocation4], 0 }
   0x3   :  { %10 = vsyncpa [#allocation4 + $0x1], 0 }
   0x4   :  { %11 = vsyncpa [#allocation7], 0 }
   0x5   :  { %13 = vsyncpa [#allocation7 + $0x1], 0 }
   0x6   :  { %14 = vsyncpa [#allocation5], 0 }
   0x7   :  { %16 = vsyncpa [#allocation5 + $0x1], 0  ;;  %s786_s12 = smov 0   ;;  %s788_s13 = smov 0  }
   0x8   :  { %s790_s14 = smov 0   ;;  %s792_s15 = smov 0  }
   0x9   :  { %s794_s16 = smov 0   ;;  %s796_s17 = smov 0  }
   0xa   :  { %s798_s18 = smov 0   ;;  %s800_s19 = smov 0  }
   0xb   :  { %s802_s20 = smov 0   ;;  %s804_s21 = smov 0  }
   0xc   :  { %s806_s22 = smov 0  }
   0xd LB: > { %1039 = sst [smem:[#allocation12_spill]] %s739_s17  ;;  %s438_s23 = sadd.s32 4294967295, %s759_s22   ;;  %s759_s22 = sphi %s806_s22, %s22_s22   ;;  %s755_s21 = sphi %s804_s21, %s1062_s21   ;;  %s751_s20 = sphi %s802_s20, %s1069_s20   ;;  %s747_s19 = sphi %s800_s19, %s1060_s19   ;;  %s743_s18 = sphi %s798_s18, %s1068_s18   ;;  %s739_s17 = sphi %s796_s17, %s1059_s17   ;;  %s735_s16 = sphi %s794_s16, %s1067_s16   ;;  %s731_s15 = sphi %s792_s15, %s1066_s15   ;;  %s727_s14 = sphi %s790_s14, %s1065_s14   ;;  %s723_s13 = sphi %s788_s13, %s1064_s13   ;;  %s719_s12 = sphi %s786_s12, %s1063_s12  }
   0xe   : > { %1040 = sst [smem:[#allocation13_spill]] %s755_s21  ;;  %s439_s24 = sadd.s32 4294967294, %s759_s22  }
   0xf   : > { %s31_s25 = sadd.s32 1, %s751_s20  ;;  %s34_s26 = sadd.s32 1, %s755_s21 }
  0x10   : > { %p32_p0 = scmp.ge.s32.totalorder %s31_s25, 2  ;;  %s41_s27 = sadd.s32 1, %s739_s17 }
  0x11   : > { %p48_p1 = scmp.ne.s32.totalorder %s739_s17, %s735_s16  ;;  %p49_p2 = scmp.eq.s32.totalorder %s759_s22, 0 }
  0x12   : > { %s1071_s25 = smov (%p32_p0, %s31_s25), 0  ;;  %s1073_s26 = smov (!%p32_p0, %s34_s26), %s755_s21 }
  0x13   : > { %1041 = sst [smem:[#allocation14_spill]] %s1071_s25  ;;  %p857_p3 = por %p49_p2, %p48_p1 }
  0x14   : > { %p54_p4 = scmp.ne.s32.totalorder %s735_s16, %s731_s15  ;;  %p36_p5 = scmp.ge.s32.totalorder %s1073_s26, 2 }
  0x15   : > { %p863_p6 = scmp.eq.s32.totalorder %s438_s23, 0  ;;  %s64_s30 = ssub.s32 %s751_s20, %s1071_s25 }
  0x16   : > { %s67_s4 = sadd.s32 1, %s727_s14  ;;  %s1075_s26 = smov (%p36_p5, %s1073_s26), 0 }
  0x17   : > { %1044 = sst [smem:[#allocation15_spill]] %s1075_s26  ;;  %p877_p7 = por %p863_p6, %p54_p4 }
  0x18   : > { %p65_p8 = scmp.eq.s32.totalorder %s64_s30, 0  ;;  %s38_s6 = ssub.s32 %s755_s21, %s1075_s26 }
  0x19   : > { %p74_p9 = scmp.ne.s32.totalorder %s727_s14, %s723_s13  ;;  %p39_p10 = scmp.eq.s32.totalorder %s38_s6, 0 }
  0x1a   : > { %p80_p11 = scmp.ne.s32.totalorder %s723_s13, %s719_s12  ;;  %p125_p0 = scmp.eq.s32.totalorder %s438_s23, 3 }
  0x1b   : > { %s888_s7 = scalar_select %p65_p8, %s727_s14, %s67_s4  }
  0x1c   : > { %s891_s8 = scalar_select %p39_p10, %s739_s17, %s41_s27  }
  0x1d   : > { %1046 = sst [smem:[#allocation16_spill]] %s888_s7  ;;  %p895_p12 = por %p74_p9, %p49_p2 }
  0x1e   : > { %1047 = sst [smem:[#allocation17_spill]] %s891_s8  ;;  %p901_p13 = por %p80_p11, %p863_p6 }
  0x1f   : > { %p131_p5 = scmp.eq.s32.totalorder %s439_s24, 3  ;;  %p474_p8 = scmp.lt.s32.totalorder %s759_s22, 4 }
  0x20   : > { %p909_p10 = por %p125_p0, %p48_p1  ;;  %s154_s27 = sand.u32 1, %s739_s17  }
  0x21   : > { %p916_p2 = por %p131_p5, %p54_p4  ;;  %s443_s29 = sshll.u32 %s755_s21, 3 }
  0x22   : > { %s442_s30 = sshll.u32 %s154_s27, 3  ;;  %s1053_s0 = sld [smem:[#allocation19_spill]] }
  0x23   : > { %s1051_s12 = scalar_select %p916_p2, 1, 0 }
  0x24   : > { %s158_s26 = scalar_lea.vmem [#allocation3], %s442_s30  ;;  %p464_p1 = pnand %p474_p8, %p857_p3 }
  0x25   : > { %1052 = sst [smem:[#allocation18_spill]] %s1051_s12  ;;  %s166_s25 = sshll.u32 %s158_s26, 4  ;;  %s167_s25 = int_to_ptr.vmem [resolvable:$true] %s166_s25 }
  0x26   : > { %p933_p4 = pnand %p474_p8, %p895_p12  ;;  %p446_p6 = scmp.ge.s32.totalorder %s759_s22, 1 }
  0x27   : > { %p192_p9 = scmp.lt.s32.totalorder %s759_s22, 5  ;;  %s155_s21 = scalar_lea.sflag [#allocation4], %s154_s27 }
  0x28   : > { %s162_s24 = scalar_lea.hbm %s1053_s0, %s443_s29  ;;  %s173_s26 = sand.u32 1, %s727_s14  }
  0x29   : > { %s164_s6 = sshll.u32 %s162_s24, 4  ;;  %p939_p11 = pnand %p446_p6, %p192_p9  ;;  %s165_s6 = int_to_ptr.hbm [resolvable:$true] %s164_s6 }
  0x2a   : > { %466 = dma.hbm_to_vmem [thread:$0]  (!%p464_p1), %s165_s6, 128, %s167_s25, %s155_s21  }
  0x2b   : > { %s444_s30 = sshll.u32 %s173_s26, 6  ;;  %s445_s28 = sshll.u32 %s751_s20, 3 }
  0x2c   : > { %s181_s9 = scalar_lea.hbm %s1030_s1, %s445_s28  ;;  %s177_s24 = scalar_lea.vmem [#allocation6], %s444_s30 }
  0x2d   : > { %s184_s0 = sshll.u32 %s177_s24, 4  ;;  %s182_s17 = sshll.u32 %s181_s9, 4  ;;  %s185_s0 = int_to_ptr.vmem [resolvable:$true] %s184_s0  ;;  %s183_s17 = int_to_ptr.hbm [resolvable:$true] %s182_s17 }
  0x2e   : > { %s174_s7 = scalar_lea.sflag [#allocation7], %s173_s26  ;;  %s761_s27 = smov 256  }
  0x2f   : > { %s762_s12 = smov 128   ;;  %s763_s21 = smov 8  }
  0x30   : > { %469 = dma.hbm_to_vmem [thread:$0]  (!%p933_p4), %s183_s17, 1024, %s185_s0, %s174_s7, %s761_s27, %s762_s12, %s763_s21  }
  0x31   : > { %196 = sbr.rel (%p939_p11) target bundleno = 593 (0x251), region = 32  ;;  %s953_s25 = sand.u32 (!%p939_p11), 1, %s735_s16  }
  0x32   : > { %s447_s6 = sshll.u32 (!%p939_p11), %s953_s25, 3  ;;  %s199_s30 = scalar_lea.sflag (!%p939_p11), [#allocation4], %s953_s25 }
  0x33   : > { %s202_s28 = scalar_lea.vmem (!%p939_p11), [#allocation3], %s447_s6 }
  0x36   : > { %706 = dma.done.wait (%p877_p7), %s199_s30, 128  }
  0x37   : > { %708 = vsyncadd (%p877_p7), %s199_s30, 4294967168  ;;  %s208_s0 = sand.u32 1, %s723_s13  }
  0x38   : > { %s448_s17 = sshll.u32 %s208_s0, 6  ;;  %s209_s7 = scalar_lea.sflag [#allocation7], %s208_s0 }
  0x39   : > { %s212_s8 = scalar_lea.vmem [#allocation6], %s448_s17 }
  0x3a   : > { %710 = dma.done.wait (%p901_p13), %s209_s7, 1024  }
  0x3b   : > { %712 = vsyncadd (%p901_p13), %s209_s7, 4294966272  ;;  %s966_s12 = scalar_lea.vmem [#allocation8], %s447_s6  ;;  %p450_p3 = scmp.ne.s32.totalorder %s743_s18, 0 }
  0x3d   : > { %244 = sbr.rel (%p450_p3) target bundleno = 68 (0x44), region = 44 }
  0x42   : > { %vm245_vm0 = vcmask 7168   ;;  %v764_v0 = vmov -inf  }
  0x43   : > { %246 = vst.msk [vmem:[#allocation2] sm:$0xff] %vm245_vm0, %v764_v0 }
  0x44 PF: > { %v247_v1 = vld [vmem:[%s202_s28] sm:$0xff]  ;;  %vm249_vm1 = vcmask 523264   ;;  %v269_v6 = vld [vmem:[%s212_s8 + $0x28] sm:$0xff]  ;;  %v268_v7 = vld [vmem:[%s212_s8 + $0x20] sm:$0xff]  ;;  %vm299_vm5 = vcmask 7168   ;;  %p452_p7 = scmp.ne.s32.totalorder %s743_s18, 1 }
  0x45   : > { %v248_v2 = vmul.f32 %v247_v1, %v247_v1  ;;  %v271_v4 = vld [vmem:[%s212_s8 + $0x38] sm:$0xff]  ;;  %v270_v5 = vld [vmem:[%s212_s8 + $0x30] sm:$0xff]  ;;  %v265_v10 = vld [vmem:[%s212_s8 + $0x8] sm:$0xff] }
  0x46   : > { %283 = vmatpush.msra.mxu0 %v271_v4  ;;  %v267_v8 = vld [vmem:[%s212_s8 + $0x18] sm:$0xff]  ;;  %v266_v9 = vld [vmem:[%s212_s8 + $0x10] sm:$0xff]  ;;  %v264_v11 = vld [vmem:[%s212_s8] sm:$0xff] }
  0x47   : > { %v250_v3 = vsel %vm249_vm1, %v248_v2, 0.0 }
  0x48   : > { %251 = vadd.xlane.f32.xlu0 %v250_v3  ;;  %284 = vmatpush.msra.mxu0 %v270_v5 }
  0x4a   : > { %285 = vmatpush.msra.mxu0 %v269_v6  ;;  %v295_v22 = vld [vmem:[#allocation2] sm:$0xff] }
  0x4c   : > { %286 = vmatpush.msra.mxu0 %v268_v7 }
  0x4e   : > { %287 = vmatpush.msra.mxu0 %v267_v8 }
  0x50   : > { %288 = vmatpush.msra.mxu0 %v266_v9 }
  0x52   : > { %289 = vmatpush.msra.mxu0 %v265_v10 }
  0x54   : > { %290 = vmatpush.msra.mxu0 %v264_v11 }
  0xbb   : > { %v252_v12 = vpop.xlane.xlu0 %251 }
  0xbc   : > { %569 = vrsqrt.f32 %v252_v12  ;;  %vm259_vm3 = vweird.f32 %v252_v12 }
  0xc2   : > { %v570_v13 = vpop.eup %569 }
  0xc3   : > { %v254_v14 = vmul.f32 %v570_v13, %v252_v12  ;;  %vm260_vm2 = vweird.f32 %v570_v13 }
  0xc4   : > { %vm261_vm4 = vmor %vm259_vm3, %vm260_vm2 }
  0xc5   : > { %v255_v15 = vmul.f32 %v570_v13, %v254_v14 }
  0xc7   : > { %v256_v16 = vmul.f32 0.5, %v255_v15 }
  0xc9   : > { %v257_v17 = vsub.f32 1.5, %v256_v16 }
  0xcb   : > { %v258_v18 = vmul.f32 %v570_v13, %v257_v17 }
  0xcd   : > { %v262_v19 = vsel %vm261_vm4, %v570_v13, %v258_v18 }
  0xce   : > { %v263_v20 = vmul.f32 %v262_v19, %v247_v1 }
  0xd0   : > { %451 = vmatmul.msk.f32.vlgmr.msra.gmra.mxu0 %vm249_vm1, %v263_v20 }
 0x14d   : > { %v292_v21 = vpop.f32.mrf.mxu0 }
 0x14e   : > { %296 = vmax.xlane.f32.xlu0 %v292_v21 }
 0x1c0   : > { %304 = sbr.rel (%p452_p7) target bundleno = 578 (0x242), region = 48 }
 0x1c1   : > { %v297_v23 = vpop.xlane.xlu0 %296 }
 0x1c2   : > { %v298_v24 = vmax.f32 %v295_v22, %v297_v23 }
 0x1c4   : > { %300 = vst.msk [vmem:[#allocation2] sm:$0xff] %vm299_vm5, %v298_v24 }
 0x1c5   : > { %v765_v26 = vmov 0   ;;  %v572_v27 = vld [vmem:[%s1031_s2] ss:$0 sm:$0xff]  ;;  %vm316_vm6 = vcmask 130048  }
 0x1c6   : > { %571 = vset.pattern.permute.xlu0 %v765_v26 }
 0x1cb   : > { %v306_v25 = vld [vmem:[#allocation2] sm:$0xff] }
 0x1cc   : > { %312 = vperm.xlu0 %571, %v306_v25  }
 0x23e   : > { %v313_v28 = vpop.permute.xlu0 %312 }
 0x23f   : > { %v315_v29 = vmul.f32 %v572_v27, %v313_v28 }
 0x241   : > { %317 = vst.msk [vmem:[%s966_s12] sm:$0xff] %vm316_vm6, %v315_v29 }
 0x242 PF: > { %s454_s18 = sshll.u32 %s747_s19, 3  ;;  %s331_s23 = sshll.u32 %s966_s12, 4  ;;  %s332_s23 = int_to_ptr.vmem [resolvable:$true] %s331_s23 }
 0x243   : > { %s329_s4 = scalar_lea.hbm %s1032_s3, %s454_s18  ;;  %s319_s24 = scalar_lea.sflag [#allocation5], %s953_s25 }
 0x244   : > { %s333_s9 = sshll.u32 %s329_s4, 4  ;;  %s653_s19 = scalar_lea.hbm %s1032_s3, 16  ;;  %s334_s9 = int_to_ptr.hbm [resolvable:$true] %s333_s9 }
 0x245   : > { %s647_s27 = sshra.s32 %s334_s9, 4  ;;  %s648_s27 = int_to_ptr.hbm [resolvable:$true] %s647_s27 }
 0x246   : > { %s649_s21 = scalar_lea.hbm %s648_s27, 8  ;;  %p654_p5 = scmp.lt.s32.totalorder %s648_s27, %s1032_s3 }
 0x247   : > { %p650_p12 = scmp.ne.s32.totalorder %s648_s27, %s649_s21  ;;  %p655_p8 = scmp.lt.s32.totalorder %s653_s19, %s649_s21 }
 0x249   : > { %p651_p13 = pnand %p650_p12, %p909_p10  ;;  %p656_p1 = por %p655_p8, %p654_p5 }
 0x24b   : > { %p652_p0 = pneg %p651_p13 }
 0x24d   : > { %p657_p4 = pnand %p656_p1, %p652_p0 }
 0x24f   : > { %660 = shalt.err (!%p657_p4)
}
 0x250   : > { %461 = dma.vmem_to_hbm [thread:$0]  (%p909_p10), %s332_s23, 128, %s334_s9, %s319_s24  }
 0x251 PF: > { %p475_p6 = scmp.ge.s32.totalorder %s759_s22, 2  ;;  %s345_s17 = sand.u32 1, %s731_s15  }
 0x252   : > { %s346_s7 = scalar_lea.sflag [#allocation5], %s345_s17 }
 0x253   : > { %p471_p9 = pnand %p475_p6, %p916_p2 }
 0x255   : > { %p472_p11 = pneg %p471_p9 }
 0x257   : > { %714 = dma.done.wait (%p472_p11), %s346_s7, 128  }
 0x258   : > { %716 = vsyncadd (%p472_p11), %s346_s7, 4294967168  ;;  %s22_s22 = sadd.s32 1, %s759_s22   ;;  %s1057_s8 = sld [smem:[#allocation16_spill]] }
 0x259   : > { %p19_p3 = scmp.ge.s32.totalorder %s22_s22, 6   ;;  %s1058_s11 = sld [smem:[#allocation12_spill]] }
 0x25a   : > { %s1059_s17 = sld [smem:[#allocation17_spill]]  ;;  %s1063_s12 = smov %s723_s13 }
 0x25b   : > { %s1060_s19 = sld [smem:[#allocation13_spill]]  ;;  %s1064_s13 = smov %s727_s14 }
 0x25c   : > { %s1061_s5 = sld [smem:[#allocation14_spill]]  ;;  %s1066_s15 = smov %s735_s16 }
 0x25d   : > { %s1062_s21 = sld [smem:[#allocation15_spill]]  ;;  %s1068_s18 = smov %s751_s20 }
 0x25e   : > { %s1065_s14 = smov %s1057_s8  ;;  %21 = sbr.rel (!%p19_p3) target bundleno = 13 (0xd), region = 98 }
 0x25f   : > { %s1067_s16 = smov %s1058_s11 }
 0x262   : > { %s1069_s20 = smov %s1061_s5 }
 0x263   :  { %352 = vsyncpa [#allocation4], 1 }
 0x264   :  { %354 = vsyncpa [#allocation4 + $0x1], 1 }
 0x265   :  { %355 = vsyncpa [#allocation7], 1 }
 0x266   :  { %357 = vsyncpa [#allocation7 + $0x1], 1 }
 0x267   :  { %358 = vsyncpa [#allocation5], 1 }
 0x268   :  { %360 = vsyncpa [#allocation5 + $0x1], 1 }

</bundles_post_ra>
